<compile_context>
chip_gen: v7x
topology: tpu7x:2x2x1
jax: 0.10.0
libtpu: 0.0.40
codegen_flags: <defaults>
</compile_context>

<pallas_src>
import functools

import jax
import jax.numpy as jnp
from jax.experimental import pallas as pl
from jax.experimental.pallas import tpu as pltpu

LANE = 128


def _cnn_kernel(ids_ref, tw_ref, lw1_ref, misc_ref, out_ref, *,
                batch, seq_pad, fs_max):
    """Single-step kernel: the whole (tiny) forward pass.

    ids_ref : (fs_max, batch*seq_pad, 1) i32 -- plane k = token id at seq pos s+k
    tw_ref  : (fs_max, vocab_pad, 128)   f32 -- embedding table @ BN-folded conv W
    lw1_ref : (128, 128)                 f32 -- Linear(100, 50), zero padded
    misc_ref: (8, 128)                   f32 -- rows: [conv bias, lb1, lw2, lb2,
                                                per-lane s_out threshold, 0, 0, 0]
    out_ref : (batch, 1)                 f32
    """
    bs = batch * seq_pad
    vocab_pad = tw_ref.shape[1]
    nf_pad = lw1_ref.shape[0]                         # 128 fused-filter lanes

    lane_iota = jax.lax.broadcasted_iota(jnp.int32, (bs, vocab_pad), 1)

    # Conv taps: pure dot+accumulate chain over fs_max one-hot selections
    # (embedding gather == one-hot @ (table @ W); exact row selection at f32).
    acc = jnp.dot((lane_iota == ids_ref[0]).astype(jnp.float32), tw_ref[0],
                  preferred_element_type=jnp.float32)
    for k in range(1, fs_max):
        onehot_k = (lane_iota == ids_ref[k]).astype(jnp.float32)
        acc = acc + jnp.dot(onehot_k, tw_ref[k],
                            preferred_element_type=jnp.float32)
    acc = acc + misc_ref[0:1, :]                      # fused conv bias + BN shift

    # ReLU (Dropout is identity in eval mode), then zero invalid conv positions.
    # Zero-masking is max-preserving only because ReLU output >= 0; the threshold
    # is per-lane (s_out differs between the two fused branches, padded lanes = 0).
    c = jnp.maximum(acc, 0.0).reshape(batch, seq_pad, nf_pad)
    pos = jax.lax.broadcasted_iota(jnp.int32, (seq_pad, nf_pad), 0).astype(jnp.float32)
    c = jnp.where(pos < misc_ref[4:5, :], c, 0.0)

    m = jnp.max(c, axis=1)                            # (batch, 128) max-over-time

    # Linear(100, 50): single 128x128 matmul (original concat order preserved).
    h = (jnp.dot(m, lw1_ref[...], preferred_element_type=jnp.float32)
         + misc_ref[1:2, :])
    # Linear(50, 1): VPU multiply + lane reduction (avoid an N=1 MXU matmul).
    out_ref[...] = (jnp.sum(h * misc_ref[2:3, :], axis=1, keepdims=True)
                    + misc_ref[3:4, 0:1])


def cnn_forward(token_ids, params):
    """token_ids: (seq_len, batch) int32.  Returns (batch,) f32 logits."""
    table = params['embedding']                       # (vocab, emb) f32
    vocab, emb = table.shape
    seq_len, batch = token_ids.shape
    fs1 = params['w1'].shape[0]
    fs2 = params['w2'].shape[0]
    nf = params['b1'].shape[0]
    hid = params['lb1'].shape[0]
    fs_max = max(fs1, fs2)
    nf2 = 2 * nf

    # PyTorch's Conv2d would raise for seq_len < filter size; we require it too.
    assert seq_len >= fs_max, "seq_len must be >= max(filter_sizes)"
    assert nf2 <= LANE and hid <= LANE

    seq_pad = max(8, -(-seq_len // 8) * 8)            # sublane-aligned positions/row
    vocab_pad = max(LANE, -(-vocab // LANE) * LANE)   # lane-dense one-hot contraction
    bs = batch * seq_pad

    # ---- Fold BatchNorm2d (eval mode) + conv bias into the conv weights. ----
    def fold(w, b, bn):
        gamma, beta, mean, var = bn
        scale = gamma / jnp.sqrt(var + 1e-5)
        return w * scale[None, None, :], b * scale + (beta - mean * scale)

    w1f, b1f = fold(params['w1'], params['b1'], params['bn1'])   # (fs1, emb, nf)
    w2f, b2f = fold(params['w2'], params['b2'], params['bn2'])   # (fs2, emb, nf)

    # ---- Fuse both branches into one 128-lane filter slab. ----
    w_fused = jnp.zeros((fs_max, emb, LANE), jnp.float32)
    w_fused = w_fused.at[:fs1, :, :nf].set(w1f)
    w_fused = w_fused.at[:fs2, :, nf:nf2].set(w2f)

    # ---- Fold the embedding table into the fused conv weights (kept f32). ----
    tw = jnp.einsum('ve,keo->kvo', table.astype(jnp.float32), w_fused)
    tw = jnp.pad(tw, ((0, 0), (0, vocab_pad - vocab), (0, 0)))   # (fs_max, vp, 128)

    bias = jnp.zeros((LANE,), jnp.float32).at[:nf].set(b1f).at[nf:nf2].set(b2f)

    # ---- Linear weights, padded lane-dense (original concat order kept). ----
    lw1p = jnp.pad(params['lw1'].astype(jnp.float32),
                   ((0, LANE - nf2), (0, LANE - hid)))           # (128, 128)
    lb1row = jnp.pad(params['lb1'].astype(jnp.float32), (0, LANE - hid))
    lw2row = jnp.pad(params['lw2'][:, 0].astype(jnp.float32), (0, LANE - hid))
    lb2row = jnp.full((LANE,), params['lb2'][0], jnp.float32)

    # Per-lane valid-length threshold: s_out1 in branch-1 lanes, s_out2 in
    # branch-2 lanes, 0 in padded lanes (keeps them exactly 0 through the max).
    s_out = (jnp.zeros((LANE,), jnp.float32)
             .at[:nf].set(float(seq_len - fs1 + 1))
             .at[nf:nf2].set(float(seq_len - fs2 + 1)))

    misc = (jnp.zeros((8, LANE), jnp.float32)
            .at[0].set(bias).at[1].set(lb1row).at[2].set(lw2row)
            .at[3].set(lb2row).at[4].set(s_out))

    # ---- Shifted token ids: plane k holds the id of sequence position s+k. ----
    # The roll wraps across batch boundaries / padded rows; safe because every
    # contaminated row has s >= s_out for the lanes that tap k touches, and those
    # rows are zeroed by the per-lane mask before the max (ReLU >= 0).
    ids = jnp.pad(token_ids.T.astype(jnp.int32),
                  ((0, 0), (0, seq_pad - seq_len))).reshape(bs)
    ids_shift = jnp.stack([jnp.roll(ids, -k) for k in range(fs_max)],
                          axis=0).reshape(fs_max, bs, 1)

    inputs = [ids_shift, tw, lw1p, misc]

    def full_spec(a):
        return pl.BlockSpec(a.shape, lambda i, nd=a.ndim: (0,) * nd)

    kernel = functools.partial(_cnn_kernel, batch=batch, seq_pad=seq_pad,
                               fs_max=fs_max)

    # TODO(synk): once batch grows past toy size, make batch a leading "parallel"
    # grid axis with >=256-row M-tiles (v6e/v7x; 128 on v5e) sized against v7x's
    # 64 MiB VMEM, and emit a lane-dense (1, batch) output instead of (batch, 1).
    out = pl.pallas_call(
        kernel,
        out_shape=jax.ShapeDtypeStruct((batch, 1), jnp.float32),
        grid=(1,),
        in_specs=[full_spec(a) for a in inputs],
        out_specs=pl.BlockSpec((batch, 1), lambda i: (0, 0)),
        compiler_params=pltpu.CompilerParams(
            dimension_semantics=("arbitrary",)),
    )(*inputs)
    return out[:, 0]                                  # final .squeeze() -> (batch,)


def cnn_reference(token_ids, params):
    """Pure-JAX (XLA) reference of the PyTorch forward in eval mode."""
    x = params['embedding'][token_ids]                # (seq, batch, emb)
    x = jnp.transpose(x, (1, 0, 2))                   # (batch, seq, emb)

    def branch(w, b, bn):
        fs = w.shape[0]
        s_out = x.shape[1] - fs + 1
        c = sum(jnp.einsum('bse,ef->bsf', x[:, k:k + s_out, :], w[k])
                for k in range(fs)) + b
        gamma, beta, mean, var = bn
        c = (c - mean) / jnp.sqrt(var + 1e-5) * gamma + beta
        return jnp.max(jnp.maximum(c, 0.0), axis=1)   # (batch, nf)

    m = jnp.concatenate([branch(params['w1'], params['b1'], params['bn1']),
                         branch(params['w2'], params['b2'], params['bn2'])], axis=1)
    h = m @ params['lw1'] + params['lb1']
    return (h @ params['lw2'] + params['lb2'])[:, 0]


def make_params(key, vocab_size, emb_dim, n_filters, filter_sizes):
    ks = jax.random.split(key, 12)

    def bn_stats(k):
        k1, k2, k3, k4 = jax.random.split(k, 4)
        return (1.0 + 0.1 * jax.random.normal(k1, (n_filters,), jnp.float32),  # gamma
                0.05 * jax.random.normal(k2, (n_filters,), jnp.float32),        # beta
                0.05 * jax.random.normal(k3, (n_filters,), jnp.float32),        # mean
                1.0 + 0.2 * jax.random.uniform(k4, (n_filters,), jnp.float32))  # var

    p = {
        'embedding': jax.random.normal(ks[0], (vocab_size, emb_dim), jnp.float32) * 0.1,
        # Conv weights stored as (fs, emb, nf); equivalent to PyTorch (nf, 1, fs, emb).
        'w1': jax.random.normal(ks[1], (filter_sizes[0], emb_dim, n_filters),
                                jnp.float32) * 0.05,
        'b1': jax.random.normal(ks[2], (n_filters,), jnp.float32) * 0.01,
        'w2': jax.random.normal(ks[3], (filter_sizes[1], emb_dim, n_filters),
                                jnp.float32) * 0.05,
        'b2': jax.random.normal(ks[4], (n_filters,), jnp.float32) * 0.01,
        'bn1': bn_stats(ks[5]),
        'bn2': bn_stats(ks[6]),
        # Linear weights stored as (in, out) so the kernel computes x @ W + b.
        'lw1': jax.random.normal(ks[7], (2 * n_filters, 50), jnp.float32) * 0.05,
        'lb1': jax.random.normal(ks[8], (50,), jnp.float32) * 0.01,
        'lw2': jax.random.normal(ks[9], (50, 1), jnp.float32) * 0.05,
        'lb2': jax.random.normal(ks[10], (1,), jnp.float32) * 0.01,
    }
    return p, ks[11]


if __name__ == "__main__":
    # Small shapes consistent with the module: Linear(100, 50) forces 2*n_filters == 100.
    vocab_size, emb_dim, n_filters = 40, 32, 50
    filter_sizes = (3, 5)
    seq_len, batch = 16, 2

    key = jax.random.PRNGKey(0)
    params, key = make_params(key, vocab_size, emb_dim, n_filters, filter_sizes)
    token_ids = jax.random.randint(key, (seq_len, batch), 0, vocab_size,
                                   dtype=jnp.int32)

    out = jax.jit(cnn_forward)(token_ids, params)
    jax.block_until_ready(out)
    assert out.shape == (batch,), out.shape
    assert bool(jnp.all(jnp.isfinite(out)))

    # Cross-check against the pure-JAX reference (tolerance covers MXU default
    # matmul precision and the table@W fold reordering).
    ref = cnn_reference(token_ids, params)
    assert jnp.allclose(out, ref, rtol=3e-2, atol=3e-3), (out, ref)
    print("KERNEL_OK")
</pallas_src>

<mosaic_0001>
module attributes {stable_mosaic.version = 11 : i64} {
  func.func @_cnn_kernel(%arg0: i32, %arg1: memref<5x32x1xi32, #tpu.memory_space<vmem>>, %arg2: memref<5x128x128xf32, #tpu.memory_space<vmem>>, %arg3: memref<128x128xf32, #tpu.memory_space<vmem>>, %arg4: memref<8x128xf32, #tpu.memory_space<vmem>>, %arg5: memref<2x1xf32, #tpu.memory_space<vmem>>) attributes {dimension_semantics = [#tpu.dimension_semantics<arbitrary>], iteration_bounds = array<i64: 1>, scalar_prefetch = 0 : i64, scratch_operands = 0 : i64, tpu.core_type = #tpu.core_type<tc>, window_params = [{pipeline_mode = #tpu.pipeline_mode<synchronous>, transform_indices = @transform_0, window_bounds = array<i64: 5, 32, 1>}, {pipeline_mode = #tpu.pipeline_mode<synchronous>, transform_indices = @transform_1, window_bounds = array<i64: 5, 128, 128>}, {pipeline_mode = #tpu.pipeline_mode<synchronous>, transform_indices = @transform_2, window_bounds = array<i64: 128, 128>}, {pipeline_mode = #tpu.pipeline_mode<synchronous>, transform_indices = @transform_3, window_bounds = array<i64: 8, 128>}, {pipeline_mode = #tpu.pipeline_mode<synchronous>, transform_indices = @transform_4, window_bounds = array<i64: 2, 1>}]} {
    %0 = tpu.iota {dimensions = array<i32: 1>} : vector<32x128xi32>
    %c0 = arith.constant 0 : index
    %c0_0 = arith.constant 0 : index
    %c0_1 = arith.constant 0 : index
    %1 = vector.load %arg1[%c0, %c0_0, %c0_1] : memref<5x32x1xi32, #tpu.memory_space<vmem>>, vector<1x32x1xi32>
    %2 = vector.shape_cast %1 : vector<1x32x1xi32> to vector<32x1xi32>
    %3 = vector.broadcast %2 : vector<32x1xi32> to vector<32x128xi32>
    %4 = arith.cmpi eq, %0, %3 : vector<32x128xi32>
    %5 = arith.extui %4 : vector<32x128xi1> to vector<32x128xi32>
    %6 = arith.sitofp %5 : vector<32x128xi32> to vector<32x128xf32>
    %c0_2 = arith.constant 0 : index
    %c0_3 = arith.constant 0 : index
    %c0_4 = arith.constant 0 : index
    %7 = vector.load %arg2[%c0_2, %c0_3, %c0_4] : memref<5x128x128xf32, #tpu.memory_space<vmem>>, vector<1x128x128xf32>
    %8 = vector.shape_cast %7 : vector<1x128x128xf32> to vector<128x128xf32>
    %cst = arith.constant dense<0.000000e+00> : vector<32x128xf32>
    %9 = tpu.matmul %6, %8, %cst {dimension_numbers = #tpu.dot_dimension_numbers<[1], [0], [0], [1], [0, 0, 1, 1], [], []>} : vector<32x128xf32>, vector<128x128xf32>, vector<32x128xf32> -> vector<32x128xf32>
    %c1 = arith.constant 1 : index
    %c0_5 = arith.constant 0 : index
    %c0_6 = arith.constant 0 : index
    %10 = vector.load %arg1[%c1, %c0_5, %c0_6] : memref<5x32x1xi32, #tpu.memory_space<vmem>>, vector<1x32x1xi32>
    %11 = vector.shape_cast %10 : vector<1x32x1xi32> to vector<32x1xi32>
    %12 = vector.broadcast %11 : vector<32x1xi32> to vector<32x128xi32>
    %13 = arith.cmpi eq, %0, %12 : vector<32x128xi32>
    %14 = arith.extui %13 : vector<32x128xi1> to vector<32x128xi32>
    %15 = arith.sitofp %14 : vector<32x128xi32> to vector<32x128xf32>
    %c1_7 = arith.constant 1 : index
    %c0_8 = arith.constant 0 : index
    %c0_9 = arith.constant 0 : index
    %16 = vector.load %arg2[%c1_7, %c0_8, %c0_9] : memref<5x128x128xf32, #tpu.memory_space<vmem>>, vector<1x128x128xf32>
    %17 = vector.shape_cast %16 : vector<1x128x128xf32> to vector<128x128xf32>
    %cst_10 = arith.constant dense<0.000000e+00> : vector<32x128xf32>
    %18 = tpu.matmul %15, %17, %cst_10 {dimension_numbers = #tpu.dot_dimension_numbers<[1], [0], [0], [1], [0, 0, 1, 1], [], []>} : vector<32x128xf32>, vector<128x128xf32>, vector<32x128xf32> -> vector<32x128xf32>
    %19 = arith.addf %9, %18 : vector<32x128xf32>
    %c2 = arith.constant 2 : index
    %c0_11 = arith.constant 0 : index
    %c0_12 = arith.constant 0 : index
    %20 = vector.load %arg1[%c2, %c0_11, %c0_12] : memref<5x32x1xi32, #tpu.memory_space<vmem>>, vector<1x32x1xi32>
    %21 = vector.shape_cast %20 : vector<1x32x1xi32> to vector<32x1xi32>
    %22 = vector.broadcast %21 : vector<32x1xi32> to vector<32x128xi32>
    %23 = arith.cmpi eq, %0, %22 : vector<32x128xi32>
    %24 = arith.extui %23 : vector<32x128xi1> to vector<32x128xi32>
    %25 = arith.sitofp %24 : vector<32x128xi32> to vector<32x128xf32>
    %c2_13 = arith.constant 2 : index
    %c0_14 = arith.constant 0 : index
    %c0_15 = arith.constant 0 : index
    %26 = vector.load %arg2[%c2_13, %c0_14, %c0_15] : memref<5x128x128xf32, #tpu.memory_space<vmem>>, vector<1x128x128xf32>
    %27 = vector.shape_cast %26 : vector<1x128x128xf32> to vector<128x128xf32>
    %cst_16 = arith.constant dense<0.000000e+00> : vector<32x128xf32>
    %28 = tpu.matmul %25, %27, %cst_16 {dimension_numbers = #tpu.dot_dimension_numbers<[1], [0], [0], [1], [0, 0, 1, 1], [], []>} : vector<32x128xf32>, vector<128x128xf32>, vector<32x128xf32> -> vector<32x128xf32>
    %29 = arith.addf %19, %28 : vector<32x128xf32>
    %c3 = arith.constant 3 : index
    %c0_17 = arith.constant 0 : index
    %c0_18 = arith.constant 0 : index
    %30 = vector.load %arg1[%c3, %c0_17, %c0_18] : memref<5x32x1xi32, #tpu.memory_space<vmem>>, vector<1x32x1xi32>
    %31 = vector.shape_cast %30 : vector<1x32x1xi32> to vector<32x1xi32>
    %32 = vector.broadcast %31 : vector<32x1xi32> to vector<32x128xi32>
    %33 = arith.cmpi eq, %0, %32 : vector<32x128xi32>
    %34 = arith.extui %33 : vector<32x128xi1> to vector<32x128xi32>
    %35 = arith.sitofp %34 : vector<32x128xi32> to vector<32x128xf32>
    %c3_19 = arith.constant 3 : index
    %c0_20 = arith.constant 0 : index
    %c0_21 = arith.constant 0 : index
    %36 = vector.load %arg2[%c3_19, %c0_20, %c0_21] : memref<5x128x128xf32, #tpu.memory_space<vmem>>, vector<1x128x128xf32>
    %37 = vector.shape_cast %36 : vector<1x128x128xf32> to vector<128x128xf32>
    %cst_22 = arith.constant dense<0.000000e+00> : vector<32x128xf32>
    %38 = tpu.matmul %35, %37, %cst_22 {dimension_numbers = #tpu.dot_dimension_numbers<[1], [0], [0], [1], [0, 0, 1, 1], [], []>} : vector<32x128xf32>, vector<128x128xf32>, vector<32x128xf32> -> vector<32x128xf32>
    %39 = arith.addf %29, %38 : vector<32x128xf32>
    %c4 = arith.constant 4 : index
    %c0_23 = arith.constant 0 : index
    %c0_24 = arith.constant 0 : index
    %40 = vector.load %arg1[%c4, %c0_23, %c0_24] : memref<5x32x1xi32, #tpu.memory_space<vmem>>, vector<1x32x1xi32>
    %41 = vector.shape_cast %40 : vector<1x32x1xi32> to vector<32x1xi32>
    %42 = vector.broadcast %41 : vector<32x1xi32> to vector<32x128xi32>
    %43 = arith.cmpi eq, %0, %42 : vector<32x128xi32>
    %44 = arith.extui %43 : vector<32x128xi1> to vector<32x128xi32>
    %45 = arith.sitofp %44 : vector<32x128xi32> to vector<32x128xf32>
    %c4_25 = arith.constant 4 : index
    %c0_26 = arith.constant 0 : index
    %c0_27 = arith.constant 0 : index
    %46 = vector.load %arg2[%c4_25, %c0_26, %c0_27] : memref<5x128x128xf32, #tpu.memory_space<vmem>>, vector<1x128x128xf32>
    %47 = vector.shape_cast %46 : vector<1x128x128xf32> to vector<128x128xf32>
    %cst_28 = arith.constant dense<0.000000e+00> : vector<32x128xf32>
    %48 = tpu.matmul %45, %47, %cst_28 {dimension_numbers = #tpu.dot_dimension_numbers<[1], [0], [0], [1], [0, 0, 1, 1], [], []>} : vector<32x128xf32>, vector<128x128xf32>, vector<32x128xf32> -> vector<32x128xf32>
    %49 = arith.addf %39, %48 : vector<32x128xf32>
    %c0_29 = arith.constant 0 : index
    %c0_30 = arith.constant 0 : index
    %50 = vector.load %arg4[%c0_29, %c0_30] : memref<8x128xf32, #tpu.memory_space<vmem>>, vector<1x128xf32>
    %51 = vector.broadcast %50 : vector<1x128xf32> to vector<32x128xf32>
    %52 = arith.addf %49, %51 : vector<32x128xf32>
    %cst_31 = arith.constant 0.000000e+00 : f32
    %53 = vector.broadcast %cst_31 : f32 to vector<32x128xf32>
    %54 = arith.maximumf %52, %53 : vector<32x128xf32>
    %55 = vector.shape_cast %54 : vector<32x128xf32> to vector<2x16x128xf32>
    %56 = tpu.iota {dimensions = array<i32: 0>} : vector<16x128xi32>
    %57 = arith.sitofp %56 : vector<16x128xi32> to vector<16x128xf32>
    %c4_32 = arith.constant 4 : index
    %c0_33 = arith.constant 0 : index
    %58 = vector.load %arg4[%c4_32, %c0_33] : memref<8x128xf32, #tpu.memory_space<vmem>>, vector<1x128xf32>
    %59 = vector.broadcast %58 : vector<1x128xf32> to vector<16x128xf32>
    %60 = arith.cmpf olt, %57, %59 : vector<16x128xf32>
    %cst_34 = arith.constant 0.000000e+00 : f32
    %61 = vector.shape_cast %60 : vector<16x128xi1> to vector<1x16x128xi1>
    %62 = vector.broadcast %61 : vector<1x16x128xi1> to vector<2x16x128xi1>
    %63 = vector.broadcast %cst_34 : f32 to vector<2x16x128xf32>
    %64 = arith.select %62, %55, %63 : vector<2x16x128xi1>, vector<2x16x128xf32>
    %cst_35 = arith.constant dense<0xFF800000> : vector<2x128xf32>
    %65 = vector.multi_reduction <maximumf>, %64, %cst_35 [1] : vector<2x16x128xf32> to vector<2x128xf32>
    %c0_36 = arith.constant 0 : index
    %c0_37 = arith.constant 0 : index
    %66 = vector.load %arg3[%c0_36, %c0_37] : memref<128x128xf32, #tpu.memory_space<vmem>>, vector<128x128xf32>
    %cst_38 = arith.constant dense<0.000000e+00> : vector<2x128xf32>
    %67 = tpu.matmul %65, %66, %cst_38 {dimension_numbers = #tpu.dot_dimension_numbers<[1], [0], [0], [1], [0, 0, 1, 1], [], []>} : vector<2x128xf32>, vector<128x128xf32>, vector<2x128xf32> -> vector<2x128xf32>
    %c1_39 = arith.constant 1 : index
    %c0_40 = arith.constant 0 : index
    %68 = vector.load %arg4[%c1_39, %c0_40] : memref<8x128xf32, #tpu.memory_space<vmem>>, vector<1x128xf32>
    %69 = vector.broadcast %68 : vector<1x128xf32> to vector<2x128xf32>
    %70 = arith.addf %67, %69 : vector<2x128xf32>
    %c2_41 = arith.constant 2 : index
    %c0_42 = arith.constant 0 : index
    %71 = vector.load %arg4[%c2_41, %c0_42] : memref<8x128xf32, #tpu.memory_space<vmem>>, vector<1x128xf32>
    %72 = vector.broadcast %71 : vector<1x128xf32> to vector<2x128xf32>
    %73 = arith.mulf %70, %72 : vector<2x128xf32>
    %cst_43 = arith.constant dense<0.000000e+00> : vector<2xf32>
    %74 = vector.multi_reduction <add>, %73, %cst_43 [1] : vector<2x128xf32> to vector<2xf32>
    %75 = vector.shape_cast %74 : vector<2xf32> to vector<2x1xf32>
    %c3_44 = arith.constant 3 : index
    %c0_45 = arith.constant 0 : index
    %76 = vector.load %arg4[%c3_44, %c0_45] : memref<8x128xf32, #tpu.memory_space<vmem>>, vector<1x1xf32>
    %77 = vector.broadcast %76 : vector<1x1xf32> to vector<2x1xf32>
    %78 = arith.addf %75, %77 : vector<2x1xf32>
    %c0_46 = arith.constant 0 : index
    %c0_47 = arith.constant 0 : index
    %79 = vector.load %arg5[%c0_46, %c0_47] : memref<2x1xf32, #tpu.memory_space<vmem>>, vector<2x1xf32>
    tpu.vector_store %arg5[%c0_46, %c0_47], %78 {strides = array<i32>} : memref<2x1xf32, #tpu.memory_space<vmem>>, vector<2x1xf32>,
    return
  }
  func.func @transform_0(%arg0: i32) -> (i32, i32, i32) {
    %c0_i32 = arith.constant 0 : i32
    %c0_i32_0 = arith.constant 0 : i32
    %c0_i32_1 = arith.constant 0 : i32
    %c0_i32_2 = arith.constant 0 : i32
    return %c0_i32, %c0_i32_0, %c0_i32_1 : i32, i32, i32
  }
  func.func @transform_1(%arg0: i32) -> (i32, i32, i32) {
    %c0_i32 = arith.constant 0 : i32
    %c0_i32_0 = arith.constant 0 : i32
    %c0_i32_1 = arith.constant 0 : i32
    %c0_i32_2 = arith.constant 0 : i32
    return %c0_i32, %c0_i32_0, %c0_i32_1 : i32, i32, i32
  }
  func.func @transform_2(%arg0: i32) -> (i32, i32) {
    %c0_i32 = arith.constant 0 : i32
    %c0_i32_0 = arith.constant 0 : i32
    %c0_i32_1 = arith.constant 0 : i32
    return %c0_i32, %c0_i32_0 : i32, i32
  }
  func.func @transform_3(%arg0: i32) -> (i32, i32) {
    %c0_i32 = arith.constant 0 : i32
    %c0_i32_0 = arith.constant 0 : i32
    %c0_i32_1 = arith.constant 0 : i32
    return %c0_i32, %c0_i32_0 : i32, i32
  }
  func.func @transform_4(%arg0: i32) -> (i32, i32) {
    %c0_i32 = arith.constant 0 : i32
    %c0_i32_0 = arith.constant 0 : i32
    %c0_i32_1 = arith.constant 0 : i32
    return %c0_i32, %c0_i32_0 : i32, i32
  }
}

</mosaic_0001>

<bundles_post_ra>
// kernel: cnn_forward.1
= control target key start
LH: loop header
LB: loop body
LE: loop exit
PB: predicated region body
PF: predicated region fallthrough
CT: control target
= control target key end

     0   :  { %v1523_v0 = vmov 0   ;;  %s1971_s0 = inlined_call_operand.vmem [shape: s32[5,32,1], index: 0, kind: input, shape index: {}]   ;;  %s1972_s1 = inlined_call_operand.vmem [shape: f32[5,128,128], index: 1, kind: input, shape index: {}]   ;;  %s1973_s2 = inlined_call_operand.vmem [shape: f32[128,128], index: 2, kind: input, shape index: {}]   ;;  %s1974_s3 = inlined_call_operand.vmem [shape: f32[8,128], index: 3, kind: input, shape index: {}]   ;;  %s1975_s4 = inlined_call_operand.vmem [shape: f32[2,1], index: 4, kind: output, shape index: {}]  }
   0x1   :  { %1522 = vset.pattern.permute.xlu1 %v1523_v0  ;;  %1521 = vset.pattern.permute.xlu0 %v1523_v0  ;;  %v887_v1 = vld [vmem:[%s1971_s0 + $0x50] sm:$0xff]  ;;  %v885_v2 = vld [vmem:[%s1971_s0 + $0x40] sm:$0xff]  ;;  %v888_v3 = vld [vmem:[%s1971_s0 + $0x58] sm:$0xff] }
   0x2   :  { %291 = vperm.xlu1 %1522, %v887_v1   ;;  %285 = vperm.xlu0 %1521, %v885_v2   ;;  %v886_v4 = vld [vmem:[%s1971_s0 + $0x48] sm:$0xff]  ;;  %v913_v5 = vld [vmem:[%s1971_s0 + $0x60] sm:$0xff]  ;;  %v895_v9 = vld [vmem:[%s1972_s1 + $0x110] sm:$0xff] }
   0x3   :  { %v853_v6 = vld [vmem:[%s1971_s0 + $0x20] sm:$0xff]  ;;  %v894_v8 = vld [vmem:[%s1972_s1 + $0x108] sm:$0xff]  ;;  %v896_v10 = vld [vmem:[%s1972_s1 + $0x118] sm:$0xff] }
   0x4   :  { %v893_v7 = vld [vmem:[%s1972_s1 + $0x100] sm:$0xff]  ;;  %v1384_v12 = vpack.c.bf16 %v896_v10, %v895_v9  ;;  %v862_v14 = vld [vmem:[%s1972_s1 + $0x88] sm:$0xff]  ;;  %v863_v18 = vld [vmem:[%s1972_s1 + $0x90] sm:$0xff] }
   0x5   :  { %v1380_v11 = vpack.c.bf16 %v894_v8, %v893_v7  ;;  %v861_v13 = vld [vmem:[%s1972_s1 + $0x80] sm:$0xff]  ;;  %v898_v17 = vld [vmem:[%s1972_s1 + $0x128] sm:$0xff]  ;;  %v864_v19 = vld [vmem:[%s1972_s1 + $0x98] sm:$0xff] }
   0x6   :  { %294 = vperm.xlu1 %1522, %v888_v3   ;;  %288 = vperm.xlu0 %1521, %v886_v4   ;;  %v897_v15 = vld [vmem:[%s1972_s1 + $0x120] sm:$0xff]  ;;  %v1316_v16 = vpack.c.bf16 %v862_v14, %v861_v13  ;;  %v914_v20 = vld [vmem:[%s1971_s0 + $0x68] sm:$0xff]  ;;  %v1320_v22 = vpack.c.bf16 %v864_v19, %v863_v18  ;;  %v899_v26 = vld [vmem:[%s1972_s1 + $0x130] sm:$0xff] }
   0x7   :  { %v854_v21 = vld [vmem:[%s1971_s0 + $0x28] sm:$0xff]  ;;  %1381 = vmatprep.subr.bf16.mxu0 %v1380_v11  ;;  %v865_v23 = vld [vmem:[%s1972_s1 + $0xa0] sm:$0xff]  ;;  %v1388_v25 = vpack.c.bf16 %v898_v17, %v897_v15  ;;  %v900_v27 = vld [vmem:[%s1972_s1 + $0x138] sm:$0xff]  ;;  %v1524_v17 = vmov 1.0  }
   0x8   :  { %1383 = vmatpush3.bf16.msra.mxu0 %v1380_v11  ;;  %1317 = vmatprep.subr.bf16.mxu1 %v1316_v16  ;;  %v866_v24 = vld [vmem:[%s1972_s1 + $0xa8] sm:$0xff]  ;;  %v915_v28 = vld [vmem:[%s1971_s0 + $0x70] sm:$0xff]  ;;  %v868_v32 = vld [vmem:[%s1972_s1 + $0xb8] sm:$0xff]  ;;  %v1392_v33 = vpack.c.bf16 %v900_v27, %v899_v26  ;;  %v17_v11 = vlaneseq }
   0x9   :  { %1385 = vmatprep.subr.bf16.mxu0 %v1384_v12  ;;  %1319 = vmatpush3.bf16.msra.mxu1 %v1316_v16  ;;  %v855_v29 = vld [vmem:[%s1971_s0 + $0x30] sm:$0xff]  ;;  %v1324_v30 = vpack.c.bf16 %v866_v24, %v865_v23  ;;  %v901_v34 = vld [vmem:[%s1972_s1 + $0x140] sm:$0xff]  ;;  %v902_v35 = vld [vmem:[%s1972_s1 + $0x148] sm:$0xff] }
   0xa   :  { %420 = vperm.xlu1 %1522, %v913_v5   ;;  %69 = vperm.xlu0 %1521, %v853_v6   ;;  %v867_v31 = vld [vmem:[%s1972_s1 + $0xb0] sm:$0xff]  ;;  %v916_v36 = vld [vmem:[%s1971_s0 + $0x78] sm:$0xff]  ;;  %v869_v39 = vld [vmem:[%s1972_s1 + $0xc0] sm:$0xff]  ;;  %v1396_v41 = vpack.c.bf16 %v902_v35, %v901_v34 }
   0xb   :  { %1321 = vmatprep.subr.bf16.mxu1 %v1320_v22  ;;  %v856_v37 = vld [vmem:[%s1971_s0 + $0x38] sm:$0xff]  ;;  %v1328_v38 = vpack.c.bf16 %v868_v32, %v867_v31  ;;  %v870_v40 = vld [vmem:[%s1972_s1 + $0xc8] sm:$0xff]  ;;  %v903_v42 = vld [vmem:[%s1972_s1 + $0x150] sm:$0xff] }
   0xc   :  { %1387 = vmatpush3.bf16.msra.mxu0 %v1384_v12  ;;  %v904_v43 = vld [vmem:[%s1972_s1 + $0x158] sm:$0xff]  ;;  %v941_v44 = vld [vmem:[%s1971_s0 + $0x80] sm:$0xff]  ;;  %v1332_v46 = vpack.c.bf16 %v870_v40, %v869_v39  ;;  %v871_v47 = vld [vmem:[%s1972_s1 + $0xd0] sm:$0xff]  ;;  %v1722_v12 = vand.u32 127, %v17_v11 }
   0xd   :  { %1389 = vmatprep.subr.bf16.mxu0 %v1388_v25  ;;  %1323 = vmatpush3.bf16.msra.mxu1 %v1320_v22  ;;  %v19_v45 = vld [vmem:[%s1971_s0] sm:$0xff]  ;;  %v872_v48 = vld [vmem:[%s1972_s1 + $0xd8] sm:$0xff]  ;;  %v1400_v49 = vpack.c.bf16 %v904_v43, %v903_v42  ;;  %v906_v51 = vld [vmem:[%s1972_s1 + $0x168] sm:$0xff] }
   0xe   :  { %423 = vperm.xlu1 %1522, %v914_v20   ;;  %72 = vperm.xlu0 %1521, %v854_v21   ;;  %v905_v50 = vld [vmem:[%s1972_s1 + $0x160] sm:$0xff]  ;;  %v942_v52 = vld [vmem:[%s1971_s0 + $0x88] sm:$0xff]  ;;  %v1336_v54 = vpack.c.bf16 %v872_v48, %v871_v47  ;;  %v907_v58 = vld [vmem:[%s1972_s1 + $0x170] sm:$0xff] }
   0xf   :  { %1325 = vmatprep.subr.bf16.mxu1 %v1324_v30  ;;  %v20_v53 = vld [vmem:[%s1971_s0 + $0x8] sm:$0xff]  ;;  %v873_v55 = vld [vmem:[%s1972_s1 + $0xe0] sm:$0xff]  ;;  %v1404_v57 = vpack.c.bf16 %v906_v51, %v905_v50  ;;  %v908_v59 = vld [vmem:[%s1972_s1 + $0x178] sm:$0xff] }
  0x10   :  { %1391 = vmatpush3.bf16.msra.mxu0 %v1388_v25  ;;  %v874_v56 = vld [vmem:[%s1972_s1 + $0xe8] sm:$0xff]  ;;  %v943_v60 = vld [vmem:[%s1971_s0 + $0x90] sm:$0xff]  ;;  %v876_v0 = vld [vmem:[%s1972_s1 + $0xf8] sm:$0xff]  ;;  %v1408_v1 = vpack.c.bf16 %v908_v59, %v907_v58 }
  0x11   :  { %1393 = vmatprep.subr.bf16.mxu0 %v1392_v33  ;;  %1327 = vmatpush3.bf16.msra.mxu1 %v1324_v30  ;;  %v21_v61 = vld [vmem:[%s1971_s0 + $0x10] sm:$0xff]  ;;  %v1340_v62 = vpack.c.bf16 %v874_v56, %v873_v55  ;;  %v944_v2 = vld [vmem:[%s1971_s0 + $0x98] sm:$0xff]  ;;  %v921_v3 = vld [vmem:[%s1972_s1 + $0x180] sm:$0xff] }
  0x12   :  { %426 = vperm.xlu1 %1522, %v915_v28   ;;  %75 = vperm.xlu0 %1521, %v855_v29   ;;  %v875_v63 = vld [vmem:[%s1972_s1 + $0xf0] sm:$0xff]  ;;  %v922_v4 = vld [vmem:[%s1972_s1 + $0x188] sm:$0xff]  ;;  %v22_v5 = vld [vmem:[%s1971_s0 + $0x18] sm:$0xff] }
  0x13   :  { %1329 = vmatprep.subr.bf16.mxu1 %v1328_v38  ;;  %v1344_v6 = vpack.c.bf16 %v876_v0, %v875_v63  ;;  %v47_v7 = vld [vmem:[%s1972_s1] sm:$0xff]  ;;  %v48_v8 = vld [vmem:[%s1972_s1 + $0x8] sm:$0xff]  ;;  %v1412_v9 = vpack.c.bf16 %v922_v4, %v921_v3  ;;  %v923_v15 = vld [vmem:[%s1972_s1 + $0x190] sm:$0xff] }
  0x14   :  { %1395 = vmatpush3.bf16.msra.mxu0 %v1392_v33  ;;  %v1348_v10 = vpack.c.bf16 %v48_v8, %v47_v7  ;;  %v924_v16 = vld [vmem:[%s1972_s1 + $0x198] sm:$0xff]  ;;  %v925_v21 = vld [vmem:[%s1972_s1 + $0x1a0] sm:$0xff]  ;;  %v926_v22 = vld [vmem:[%s1972_s1 + $0x1a8] sm:$0xff] }
  0x15   :  { %1397 = vmatprep.subr.bf16.mxu0 %v1396_v41  ;;  %1331 = vmatpush3.bf16.msra.mxu1 %v1328_v38  ;;  %v1416_v20 = vpack.c.bf16 %v924_v16, %v923_v15  ;;  %v1420_v25 = vpack.c.bf16 %v926_v22, %v925_v21  ;;  %v49_v26 = vld [vmem:[%s1972_s1 + $0x10] sm:$0xff]  ;;  %v50_v27 = vld [vmem:[%s1972_s1 + $0x18] sm:$0xff]  ;;  %v51_v33 = vld [vmem:[%s1972_s1 + $0x20] sm:$0xff] }
  0x16   :  { %429 = vperm.xlu1 %1522, %v916_v36   ;;  %78 = vperm.xlu0 %1521, %v856_v37   ;;  %v927_v28 = vld [vmem:[%s1972_s1 + $0x1b0] sm:$0xff]  ;;  %v928_v29 = vld [vmem:[%s1972_s1 + $0x1b8] sm:$0xff]  ;;  %v1352_v31 = vpack.c.bf16 %v50_v27, %v49_v26  ;;  %v52_v34 = vld [vmem:[%s1972_s1 + $0x28] sm:$0xff] }
  0x17   :  { %1333 = vmatprep.subr.bf16.mxu1 %v1332_v46  ;;  %v1424_v32 = vpack.c.bf16 %v928_v29, %v927_v28  ;;  %v929_v35 = vld [vmem:[%s1972_s1 + $0x1c0] sm:$0xff]  ;;  %v930_v36 = vld [vmem:[%s1972_s1 + $0x1c8] sm:$0xff]  ;;  %v1356_v38 = vpack.c.bf16 %v52_v34, %v51_v33  ;;  %v53_v40 = vld [vmem:[%s1972_s1 + $0x30] sm:$0xff] }
  0x18   :  { %1399 = vmatpush3.bf16.msra.mxu0 %v1396_v41  ;;  %v1428_v39 = vpack.c.bf16 %v930_v36, %v929_v35  ;;  %v54_v41 = vld [vmem:[%s1972_s1 + $0x38] sm:$0xff]  ;;  %v931_v42 = vld [vmem:[%s1972_s1 + $0x1d0] sm:$0xff]  ;;  %v55_v47 = vld [vmem:[%s1972_s1 + $0x40] sm:$0xff] }
  0x19   :  { %1401 = vmatprep.subr.bf16.mxu0 %v1400_v49  ;;  %1335 = vmatpush3.bf16.msra.mxu1 %v1332_v46  ;;  %v932_v43 = vld [vmem:[%s1972_s1 + $0x1d8] sm:$0xff]  ;;  %v933_v50 = vld [vmem:[%s1972_s1 + $0x1e0] sm:$0xff]  ;;  %v934_v51 = vld [vmem:[%s1972_s1 + $0x1e8] sm:$0xff] }
  0x1a   :  { %555 = vperm.xlu1 %1522, %v941_v44   ;;  %24 = vperm.xlu0 %1521, %v19_v45   ;;  %v1360_v45 = vpack.c.bf16 %v54_v41, %v53_v40  ;;  %v1432_v46 = vpack.c.bf16 %v932_v43, %v931_v42  ;;  %v57_v55 = vld [vmem:[%s1972_s1 + $0x50] sm:$0xff]  ;;  %v58_v56 = vld [vmem:[%s1972_s1 + $0x58] sm:$0xff]  ;;  %v60_v63 = vld [vmem:[%s1972_s1 + $0x68] sm:$0xff] }
  0x1b   :  { %1337 = vmatprep.subr.bf16.mxu1 %v1336_v54  ;;  %v936_v58 = vld [vmem:[%s1972_s1 + $0x1f8] sm:$0xff]  ;;  %v949_v0 = vld [vmem:[%s1972_s1 + $0x200] sm:$0xff]  ;;  %v951_v8 = vld [vmem:[%s1972_s1 + $0x210] sm:$0xff] }
  0x1c   :  { %1403 = vmatpush3.bf16.msra.mxu0 %v1400_v49  ;;  %v56_v49 = vld [vmem:[%s1972_s1 + $0x48] sm:$0xff]  ;;  %v956_v21 = vld [vmem:[%s1972_s1 + $0x238] sm:$0xff]  ;;  %v959_v27 = vld [vmem:[%s1972_s1 + $0x250] sm:$0xff] }
  0x1d   :  { %1405 = vmatprep.subr.bf16.mxu0 %v1404_v57  ;;  %1339 = vmatpush3.bf16.msra.mxu1 %v1336_v54  ;;  %v1436_v54 = vpack.c.bf16 %v934_v51, %v933_v50  ;;  %v954_v15 = vld [vmem:[%s1972_s1 + $0x228] sm:$0xff]  ;;  %v960_v28 = vld [vmem:[%s1972_s1 + $0x258] sm:$0xff]  ;;  %v963_v33 = vld [vmem:[%s1972_s1 + $0x270] sm:$0xff] }
  0x1e   :  { %558 = vperm.xlu1 %1522, %v942_v52   ;;  %27 = vperm.xlu0 %1521, %v20_v53   ;;  %v1364_v53 = vpack.c.bf16 %v56_v49, %v55_v47  ;;  %v1464_v29 = vpack.c.bf16 %v960_v28, %v959_v27  ;;  %v964_v34 = vld [vmem:[%s1972_s1 + $0x278] sm:$0xff]  ;;  %v731_v40 = vld [vmem:[%s1973_s2] sm:$0xff]  ;;  %v732_v41 = vld [vmem:[%s1973_s2 + $0x8] sm:$0xff] }
  0x1f   :  { %1341 = vmatprep.subr.bf16.mxu1 %v1340_v62  ;;  %v1472_v36 = vpack.c.bf16 %v964_v34, %v963_v33  ;;  %v1477_v42 = vpack.c.bf16 %v732_v41, %v731_v40  ;;  %v733_v43 = vld [vmem:[%s1973_s2 + $0x10] sm:$0xff]  ;;  %v739_v50 = vld [vmem:[%s1973_s2 + $0x40] sm:$0xff]  ;;  %v740_v51 = vld [vmem:[%s1973_s2 + $0x48] sm:$0xff] }
  0x20   :  { %1407 = vmatpush3.bf16.msra.mxu0 %v1404_v57  ;;  %v935_v57 = vld [vmem:[%s1972_s1 + $0x1f0] sm:$0xff] }
  0x21   :  { %1409 = vmatprep.subr.bf16.mxu0 %v1408_v1  ;;  %1343 = vmatpush3.bf16.msra.mxu1 %v1340_v62  ;;  %v59_v62 = vld [vmem:[%s1972_s1 + $0x60] sm:$0xff]  ;;  %v737_v47 = vld [vmem:[%s1973_s2 + $0x30] sm:$0xff] }
  0x22   :  { %561 = vperm.xlu1 %1522, %v943_v60   ;;  %30 = vperm.xlu0 %1521, %v21_v61   ;;  %v1368_v60 = vpack.c.bf16 %v58_v56, %v57_v55  ;;  %v1440_v61 = vpack.c.bf16 %v936_v58, %v935_v57  ;;  %v743_v56 = vld [vmem:[%s1973_s2 + $0x60] sm:$0xff]  ;;  %v744_v57 = vld [vmem:[%s1973_s2 + $0x68] sm:$0xff] }
  0x23   :  { %1345 = vmatprep.subr.bf16.mxu1 %v1344_v6  ;;  %v1495_v58 = vpack.c.bf16 %v744_v57, %v743_v56 }
  0x24   :  { %1411 = vmatpush3.bf16.msra.mxu0 %v1408_v1  ;;  %v950_v1 = vld [vmem:[%s1972_s1 + $0x208] sm:$0xff] }
  0x25   :  { %1413 = vmatprep.subr.bf16.mxu0 %v1412_v9  ;;  %1347 = vmatpush3.bf16.msra.mxu1 %v1344_v6  ;;  %v1444_v3 = vpack.c.bf16 %v950_v1, %v949_v0  ;;  %v62_v6 = vld [vmem:[%s1972_s1 + $0x78] sm:$0xff] }
  0x26   :  { %564 = vperm.xlu1 %1522, %v944_v2   ;;  %33 = vperm.xlu0 %1521, %v22_v5   ;;  %v1372_v2 = vpack.c.bf16 %v60_v63, %v59_v62  ;;  %v61_v5 = vld [vmem:[%s1972_s1 + $0x70] sm:$0xff]  ;;  %v1527_v62 = vmov 0.0  }
  0x27   :  { %1349 = vmatprep.subr.bf16.mxu1 %v1348_v10 }
  0x81   :  { %v292_v13 = vpop.permute.xlu1 %291  ;;  %v286_v14 = vpop.permute.xlu0 %285 }
  0x82   :  { %vm296_vm0 = vcmp.eq.s32.totalorder %v1722_v12, %v286_v14  ;;  %vm298_vm1 = vcmp.eq.s32.totalorder %v1722_v12, %v292_v13  ;;  %v953_v14 = vld [vmem:[%s1972_s1 + $0x220] sm:$0xff] }
  0x83   :  { %1199 = vmatprep.mubr.msk.f32.mxu0 %vm296_vm0, %v1524_v17 }
  0x85   :  { %v295_v18 = vpop.permute.xlu1 %294  ;;  %v289_v19 = vpop.permute.xlu0 %288 }
  0x86   :  { %vm297_vm2 = vcmp.eq.s32.totalorder %v1722_v12, %v289_v19  ;;  %vm299_vm3 = vcmp.eq.s32.totalorder %v1722_v12, %v295_v18  ;;  %v1452_v19 = vpack.c.bf16 %v954_v15, %v953_v14 }
  0x87   :  { %1200 = vmatmul.mubr.msk.f32.vlgmr.msra.gmra.mrb[0].mxu0 %vm297_vm2, %v1524_v17 }
  0x88   :  { %1415 = vmatpush3.bf16.msra.mxu0 %v1412_v9  ;;  %1202 = vmatprep.mubr.msk.f32.mxu0 %vm298_vm1, %v1524_v17  ;;  %v952_v9 = vld [vmem:[%s1972_s1 + $0x218] sm:$0xff] }
  0x89   :  { %v421_v23 = vpop.permute.xlu1 %420  ;;  %v70_v24 = vpop.permute.xlu0 %69  ;;  %1417 = vmatprep.subr.bf16.mxu0 %v1416_v20  ;;  %v1448_v13 = vpack.c.bf16 %v952_v9, %v951_v8  ;;  %v970_v9 = vld [vmem:[%s1974_s3 + $0x4] ss:$0 sm:$0xff] }
  0x8a   :  { %vm431_vm4 = vcmp.eq.s32.totalorder %v1722_v12, %v421_v23  ;;  %vm80_vm5 = vcmp.eq.s32.totalorder %v1722_v12, %v70_v24  ;;  %v957_v24 = vld [vmem:[%s1972_s1 + $0x240] sm:$0xff] }
  0x8b   :  { %1123 = vmatprep.mubr.msk.f32.mxu1 %vm80_vm5, %v1524_v17  ;;  %1203 = vmatmul.mubr.msk.f32.gmra.mrb[2].mxu0 %vm299_vm3, %v1524_v17 }
  0x8c   :  { %1419 = vmatpush3.bf16.msra.mxu0 %v1416_v20  ;;  %1237 = vmatprep.mubr.msk.f32.mxu0 %vm431_vm4, %v1524_v17  ;;  %v955_v20 = vld [vmem:[%s1972_s1 + $0x230] sm:$0xff]  ;;  %vm1526_vm4 = vmmov 0  }
  0x8d   :  { %v73_v30 = vpop.permute.xlu0 %72  ;;  %1421 = vmatprep.subr.bf16.mxu0 %v1420_v25  ;;  %v424_v48 = vpop.permute.xlu1 %423  ;;  %v1456_v22 = vpack.c.bf16 %v956_v21, %v955_v20 }
  0x8e   :  { %vm81_vm6 = vcmp.eq.s32.totalorder %v1722_v12, %v73_v30  ;;  %vm432_vm10 = vcmp.eq.s32.totalorder %v1722_v12, %v424_v48  ;;  %v961_v30 = vld [vmem:[%s1972_s1 + $0x260] sm:$0xff]  ;;  %v738_v48 = vld [vmem:[%s1973_s2 + $0x38] sm:$0xff] }
  0x8f   :  { %1124 = vmatmul.mubr.msk.f32.vlgmr.msra.gmra.mrb[0].mxu1 %vm81_vm6, %v1524_v17  ;;  %v1486_v49 = vpack.c.bf16 %v738_v48, %v737_v47  ;;  %v972_v47 = vld [vmem:[%s1974_s3 + $0x2] ss:$0 sm:$0xff] }
  0x90   :  { %1351 = vmatpush3.bf16.msra.mxu1 %v1348_v10  ;;  %1423 = vmatpush3.bf16.msra.mxu0 %v1420_v25  ;;  %v1376_v10 = vpack.c.bf16 %v62_v6, %v61_v5  ;;  %v958_v25 = vld [vmem:[%s1972_s1 + $0x248] sm:$0xff]  ;;  %v969_v6 = vld [vmem:[%s1974_s3] ss:$0 sm:$0xff] }
  0x91   :  { %v76_v37 = vpop.permute.xlu0 %75  ;;  %1353 = vmatprep.subr.bf16.mxu1 %v1352_v31  ;;  %1425 = vmatprep.subr.bf16.mxu0 %v1424_v32  ;;  %v427_v59 = vpop.permute.xlu1 %426  ;;  %v1460_v26 = vpack.c.bf16 %v958_v25, %v957_v24 }
  0x92   :  { %vm82_vm7 = vcmp.eq.s32.totalorder %v1722_v12, %v76_v37  ;;  %vm433_vm11 = vcmp.eq.s32.totalorder %v1722_v12, %v427_v59  ;;  %v745_v59 = vld [vmem:[%s1973_s2 + $0x70] sm:$0xff] }
  0x93   :  { %1126 = vmatprep.mubr.msk.f32.mxu1 %vm82_vm7, %v1524_v17  ;;  %vm754_vm7 = vcmask 1041409  }
  0x94   :  { %1355 = vmatpush3.bf16.msra.mxu1 %v1352_v31  ;;  %1427 = vmatpush3.bf16.msra.mxu0 %v1424_v32  ;;  %v962_v31 = vld [vmem:[%s1972_s1 + $0x268] sm:$0xff] }
  0x95   :  { %v79_v44 = vpop.permute.xlu0 %78  ;;  %1357 = vmatprep.subr.bf16.mxu1 %v1356_v38  ;;  %1429 = vmatprep.subr.bf16.mxu0 %v1428_v39  ;;  %v430_v4 = vpop.permute.xlu1 %429  ;;  %v1468_v32 = vpack.c.bf16 %v962_v31, %v961_v30 }
  0x96   :  { %vm83_vm8 = vcmp.eq.s32.totalorder %v1722_v12, %v79_v44  ;;  %vm434_vm12 = vcmp.eq.s32.totalorder %v1722_v12, %v430_v4  ;;  %v735_v44 = vld [vmem:[%s1973_s2 + $0x20] sm:$0xff] }
  0x97   :  { %1127 = vmatmul.mubr.msk.f32.gmra.mrb[2].mxu1 %vm83_vm8, %v1524_v17  ;;  %vm833_vm8 = vcmask 1041408  }
  0x98   :  { %1359 = vmatpush3.bf16.msra.mxu1 %v1356_v38  ;;  %1431 = vmatpush3.bf16.msra.mxu0 %v1428_v39  ;;  %v1525_v39 = vmov 0.0|0.0  }
  0x99   :  { %v25_v52 = vpop.permute.xlu0 %24  ;;  %1361 = vmatprep.subr.bf16.mxu1 %v1360_v45  ;;  %1433 = vmatprep.subr.bf16.mxu0 %v1432_v46  ;;  %v556_v16 = vpop.permute.xlu1 %555 }
  0x9a   :  { %vm35_vm9 = vcmp.eq.s32.totalorder %v1722_v12, %v25_v52  ;;  %vm566_vm13 = vcmp.eq.s32.totalorder %v1722_v12, %v556_v16  ;;  %v1489_v52 = vpack.c.bf16 %v740_v51, %v739_v50 }
  0x9b   :  { %1161 = vmatprep.mubr.msk.f32.mxu1 %vm35_vm9, %v1524_v17  ;;  %vm843_vm9 = vcmask 1024  }
  0x9c   :  { %1363 = vmatpush3.bf16.msra.mxu1 %v1360_v45  ;;  %1435 = vmatpush3.bf16.msra.mxu0 %v1432_v46  ;;  %v736_v45 = vld [vmem:[%s1973_s2 + $0x28] sm:$0xff] }
  0x9d   :  { %1365 = vmatprep.subr.bf16.mxu1 %v1364_v53  ;;  %1437 = vmatprep.subr.bf16.mxu0 %v1436_v54  ;;  %v28_v7 = vpop.permute.xlu0 %27  ;;  %v559_v35 = vpop.permute.xlu1 %558  ;;  %v1483_v46 = vpack.c.bf16 %v736_v45, %v735_v44  ;;  %v971_v45 = vld [vmem:[%s1974_s3 + $0x1] ss:$0 sm:$0xff] }
  0x9e   :  { %vm36_vm14 = vcmp.eq.s32.totalorder %v1722_v12, %v28_v7  ;;  %vm567_vm1 = vcmp.eq.s32.totalorder %v1722_v12, %v559_v35 }
  0xa0   :  { %1367 = vmatpush3.bf16.msra.mxu1 %v1364_v53  ;;  %1439 = vmatpush3.bf16.msra.mxu0 %v1436_v54  ;;  %v741_v53 = vld [vmem:[%s1973_s2 + $0x50] sm:$0xff]  ;;  %v742_v54 = vld [vmem:[%s1973_s2 + $0x58] sm:$0xff] }
  0xa1   :  { %1369 = vmatprep.subr.bf16.mxu1 %v1368_v60  ;;  %1441 = vmatprep.subr.bf16.mxu0 %v1440_v61  ;;  %v31_v18 = vpop.permute.xlu0 %30  ;;  %v562_v37 = vpop.permute.xlu1 %561  ;;  %v1492_v55 = vpack.c.bf16 %v742_v54, %v741_v53 }
  0xa2   :  { %vm37_vm15 = vcmp.eq.s32.totalorder %v1722_v12, %v31_v18  ;;  %vm568_vm2 = vcmp.eq.s32.totalorder %v1722_v12, %v562_v37 }
  0xa4   :  { %1371 = vmatpush3.bf16.msra.mxu1 %v1368_v60  ;;  %1443 = vmatpush3.bf16.msra.mxu0 %v1440_v61  ;;  %v746_v60 = vld [vmem:[%s1973_s2 + $0x78] sm:$0xff] }
  0xa5   :  { %1373 = vmatprep.subr.bf16.mxu1 %v1372_v2  ;;  %1445 = vmatprep.subr.bf16.mxu0 %v1444_v3  ;;  %v34_v23 = vpop.permute.xlu0 %33  ;;  %v565_v38 = vpop.permute.xlu1 %564  ;;  %v1498_v61 = vpack.c.bf16 %v746_v60, %v745_v59 }
  0xa6   :  { %vm38_vm0 = vcmp.eq.s32.totalorder %v1722_v12, %v34_v23  ;;  %vm569_vm3 = vcmp.eq.s32.totalorder %v1722_v12, %v565_v38  ;;  %v734_v12 = vld [vmem:[%s1973_s2 + $0x18] sm:$0xff] }
  0xa7   :  { %1238 = vmatmul.mubr.msk.f32.vlgmr.msra.gmra.mrb[0].mxu0 %vm432_vm10, %v1524_v17 }
  0xa8   :  { %1375 = vmatpush3.bf16.msra.mxu1 %v1372_v2  ;;  %1240 = vmatprep.mubr.msk.f32.mxu0 %vm433_vm11, %v1524_v17 }
  0xa9   :  { %1447 = vmatpush3.bf16.msra.mxu0 %v1444_v3  ;;  %1377 = vmatprep.subr.bf16.mxu1 %v1376_v10  ;;  %v698_v3 = vshrl.u32 %v17_v11, 7 }
  0xaa   :  { %1449 = vmatprep.subr.bf16.mxu0 %v1448_v13 }
  0xab   :  { %1241 = vmatmul.mubr.msk.f32.gmra.mrb[2].mxu0 %vm434_vm12, %v1524_v17  ;;  %v699_v4 = vadd.s32 8, %v698_v3 }
  0xac   :  { %1379 = vmatpush3.bf16.msra.mxu1 %v1376_v10  ;;  %1275 = vmatprep.mubr.msk.f32.mxu0 %vm566_vm13, %v1524_v17 }
  0xad   :  { %1451 = vmatpush3.bf16.msra.mxu0 %v1448_v13  ;;  %1476 = vmatprep.subr.bf16.mxu1 %v1525_v39  ;;  %v701_v7 = vcvt.s32.f32 %v699_v4  ;;  %v700_v13 = vcvt.s32.f32 %v698_v3 }
  0xae   :  { %1453 = vmatprep.subr.bf16.mxu0 %v1452_v19 }
  0xaf   :  { %1162 = vmatmul.mubr.msk.f32.vlgmr.msra.gmra.mrb[0].mxu1 %vm36_vm14, %v1524_v17  ;;  %vm1951_vm5 = vcmp.lt.f32.partialorder %v701_v7, %v970_v9  ;;  %vm707_vm6 = vcmp.lt.f32.partialorder %v700_v13, %v970_v9 }
  0xb0   :  { %1164 = vmatprep.mubr.msk.f32.mxu1 %vm37_vm15, %v1524_v17  ;;  %1478 = vmatpush3.bf16.msra.mxu1 %v1477_v42 }
  0xb1   :  { %1455 = vmatpush3.bf16.msra.mxu0 %v1452_v19  ;;  %1479 = vmatprep.subr.bf16.mxu1 %v1525_v39 }
  0xb2   :  { %1457 = vmatprep.subr.bf16.mxu0 %v1456_v22 }
  0xb3   :  { %1165 = vmatmul.mubr.msk.f32.gmra.mrb[2].mxu1 %vm38_vm0, %v1524_v17 }
  0xb4   :  { %1313 = vmatprep.mubr.msk.f32.mxu1 %vm1526_vm4, %v1527_v62 }
  0xb5   :  { %1459 = vmatpush3.bf16.msra.mxu0 %v1456_v22 }
  0xb6   :  { %1461 = vmatprep.subr.bf16.mxu0 %v1460_v26 }
  0xb9   :  { %1463 = vmatpush3.bf16.msra.mxu0 %v1460_v26 }
  0xba   :  { %1465 = vmatprep.subr.bf16.mxu0 %v1464_v29 }
  0xbd   :  { %1467 = vmatpush3.bf16.msra.mxu0 %v1464_v29 }
  0xbe   :  { %1469 = vmatprep.subr.bf16.mxu0 %v1468_v32 }
  0xc1   :  { %1471 = vmatpush3.bf16.msra.mxu0 %v1468_v32 }
  0xc2   :  { %1473 = vmatprep.subr.bf16.mxu0 %v1472_v36 }
  0xc5   :  { %1475 = vmatpush3.bf16.msra.mxu0 %v1472_v36 }
  0xc8   :  { %1276 = vmatmul.mubr.msk.f32.vlgmr.msra.gmra.mrb[0].mxu0 %vm567_vm1, %v1524_v17 }
  0xc9   :  { %1278 = vmatprep.mubr.msk.f32.mxu0 %vm568_vm2, %v1524_v17 }
  0xcc   :  { %1279 = vmatmul.mubr.msk.f32.gmra.mrb[2].mxu0 %vm569_vm3, %v1524_v17  ;;  %v1480_v17 = vpack.c.bf16 %v734_v12, %v733_v43 }
  0xce   :  { %1481 = vmatpush3.bf16.msra.mxu1 %v1480_v17 }
  0xcf   :  { %1482 = vmatprep.subr.bf16.mxu1 %v1525_v39 }
  0xd2   :  { %1484 = vmatpush3.bf16.msra.mxu1 %v1483_v46 }
  0xd3   :  { %1485 = vmatprep.subr.bf16.mxu1 %v1525_v39 }
  0xd6   :  { %1487 = vmatpush3.bf16.msra.mxu1 %v1486_v49 }
  0xd7   :  { %1488 = vmatprep.subr.bf16.mxu1 %v1525_v39 }
  0xda   :  { %1490 = vmatpush3.bf16.msra.mxu1 %v1489_v52  ;;  %v973_v52 = vld [vmem:[%s1974_s3 + $0x3] ss:$0 sm:$0xff] }
  0xdb   :  { %1491 = vmatprep.subr.bf16.mxu1 %v1525_v39 }
  0xde   :  { %1493 = vmatpush3.bf16.msra.mxu1 %v1492_v55 }
  0xdf   :  { %1494 = vmatprep.subr.bf16.mxu1 %v1525_v39 }
  0xe2   :  { %1496 = vmatpush3.bf16.msra.mxu1 %v1495_v58 }
  0xe3   :  { %1497 = vmatprep.subr.bf16.mxu1 %v1525_v39 }
  0xe6   :  { %1499 = vmatpush3.bf16.msra.mxu1 %v1498_v61 }
 0x182   :  { %v1163_v63 = vpop.f32.mrb[0].mxu1 }
 0x183   :  { %v260_v0 = vpop.f32.mrb[1].mxu1 }
 0x186   :  { %v1166_v1 = vpop.f32.mrb[2].mxu1 }
 0x187   :  { %v270_v2 = vpop.f32.mrb[3].mxu1 }
 0x19b   :  { %v1277_v5 = vpop.f32.mrb[0].mxu0 }
 0x19c   :  { %v1500_v8 = vadd.f32 %v1277_v5, %v1163_v63  ;;  %v661_v10 = vpop.f32.mrb[1].mxu0 }
 0x19d   :  { %v1501_v14 = vadd.f32 %v661_v10, %v260_v0 }
 0x19e   :  { %v690_v15 = vadd.f32 %v1500_v8, %v969_v6 }
 0x19f   :  { %v689_v11 = vadd.f32 %v1501_v14, %v969_v6  ;;  %v1280_v18 = vpop.f32.mrb[2].mxu0 }
 0x1a0   :  { %v694_v19 = vmax.f32 %v690_v15, 0.0  ;;  %v1502_v20 = vadd.f32 %v1280_v18, %v1166_v1  ;;  %v671_v21 = vpop.f32.mrb[3].mxu0 }
 0x1a1   :  { %v693_v22 = vmax.f32 %v689_v11, 0.0  ;;  %v1503_v23 = vadd.f32 %v671_v21, %v270_v2 }
 0x1a2   :  { %v714_v24 = vsel %vm1951_vm5, %v694_v19, 0.0  ;;  %v692_v25 = vadd.f32 %v1502_v20, %v969_v6 }
 0x1a3   :  { %v713_v26 = vsel %vm707_vm6, %v693_v22, 0.0  ;;  %v691_v27 = vadd.f32 %v1503_v23, %v969_v6 }
 0x1a4   :  { %v717_v28 = vmax.f32 %v713_v26, %v714_v24  ;;  %v696_v29 = vmax.f32 %v692_v25, 0.0 }
 0x1a5   :  { %v695_v30 = vmax.f32 %v691_v27, 0.0 }
 0x1a6   :  { %v718_v31 = vrot.slane %v717_v28, 4  ;;  %v716_v32 = vsel %vm1951_vm5, %v696_v29, 0.0 }
 0x1a7   :  { %v715_v33 = vsel %vm707_vm6, %v695_v30, 0.0 }
 0x1a8   :  { %v719_v34 = vmax.f32 %v717_v28, %v718_v31  ;;  %v724_v35 = vmax.f32 %v715_v33, %v716_v32 }
 0x1aa   :  { %v720_v36 = vrot.slane %v719_v34, 2  ;;  %v725_v37 = vrot.slane %v724_v35, 4 }
 0x1ac   :  { %v721_v38 = vmax.f32 %v719_v34, %v720_v36  ;;  %v726_v39 = vmax.f32 %v724_v35, %v725_v37 }
 0x1ae   :  { %v727_v40 = vrot.slane %v726_v39, 2  ;;  %v722_v41 = vrot.slane %v721_v38, 1 }
 0x1b0   :  { %v728_v42 = vmax.f32 %v726_v39, %v727_v40  ;;  %v723_v12 = vmax.f32 %v721_v38, %v722_v41 }
 0x1b2   :  { %v729_v43 = vrot.slane %v728_v42, 1 }
 0x1b4   :  { %v730_v17 = vmax.f32 %v728_v42, %v729_v43 }
 0x1b6   :  { %v755_v44 = vsel %vm754_vm7, %v730_v17, %v723_v12 }
 0x1b7   :  { %1314 = vmatmul.mubr.f32.vlgmr.msra.gmra.mrb[4].mxu1 %v755_v44 }
 0x28a   :  { %v823_v46 = vpop.f32.mrb[4].mxu1 }
 0x28b   :  { %v824_v48 = vadd.f32 %v971_v45, %v823_v46  ;;  %v1315_v49 = vpop.f32.mrb[5].mxu1 }
 0x28d   :  { %v832_v50 = vmul.f32 %v972_v47, %v824_v48 }
 0x28f   :  { %v834_v51 = vsel %vm833_vm8, %v832_v50, 0.0 }
 0x290   :  { %835 = vadd.xlane.f32.xlu0 %v834_v51 }
 0x31d   :  { %v836_v53 = vpop.xlane.xlu0 %835 }
 0x31e   :  { %v842_v54 = vadd.f32 %v973_v52, %v836_v53 }
 0x320   :  { %844 = vst.msk [vmem:[%s1975_s4] sm:$0x3] %vm843_vm9, %v842_v54 }

</bundles_post_ra>
